<compile_context>
chip_gen: v5e
topology: v5e:2x2
jax: 0.10.0
libtpu: 0.0.40
codegen_flags: <defaults>
</compile_context>

<pallas_src>
import functools

import jax
import jax.numpy as jnp
from jax import lax
from jax.experimental import pallas as pl
from jax.experimental.pallas import tpu as pltpu

_SUBLANE = 8
_LANE = 128
_CHANNEL_TILE_CAP = 512          # max channels per block (sublane axis)


# --------------------------------------------------------------------------- #
# VMEM budget / limit (generation-aware)
# --------------------------------------------------------------------------- #
def _vmem_params():
  cap = 128 * 1024 * 1024
  try:
    info = pltpu.get_tpu_info()
    cap = int(getattr(info, "vmem_capacity_bytes", cap))
  except Exception:
    pass
  if cap <= 64 * 1024 * 1024:
    # v7x: 64 MiB per TensorCore -> tighter live-block budget + scoped limit.
    return 20 * 1024 * 1024, 52 * 1024 * 1024
  # v5e / v6e: 128 MiB VMEM -> bigger blocks, more shapes on the fused path.
  return 44 * 1024 * 1024, 100 * 1024 * 1024


# --------------------------------------------------------------------------- #
# Tile selection
# --------------------------------------------------------------------------- #
def _round_down8(v):
  return max((v // _SUBLANE) * _SUBLANE, _SUBLANE)


def _pick_tiles(n, bc, hw, itemsize, budget, channel_cap, mc_cap,
                force_two_pass, lane_tile_cap):
  """Return (use_fused, tc, tl).

  Cost model (per channel row, per lane element): double-buffered in + out
  blocks at native itemsize (4*itemsize) plus ~8 B for in-kernel f32 temps.
  """
  per_elem = 4 * itemsize + 8
  cap = min(channel_cap, mc_cap, bc)
  tc_min = bc if bc < _SUBLANE else _SUBLANE

  # --- one-pass fused path: whole reduction extent resident (tl = HW) -------
  per_c_full = n * hw * per_elem
  if (not force_two_pass) and (lane_tile_cap is None or hw <= lane_tile_cap) \
      and per_c_full * tc_min <= budget:
    tc = min(int(budget // per_c_full), cap)
    tc = bc if tc >= bc else _round_down8(tc)
    return True, tc, hw

  # --- two-pass path: keep the lane tile (contiguous DMA run) as large as ---
  # --- possible at minimum channel width, then grow channels in the budget --
  max_tl = int(budget // max(n * per_elem * tc_min, 1))
  if lane_tile_cap is not None:
    max_tl = min(max_tl, lane_tile_cap)
  if hw <= max_tl:
    tl = hw
  else:
    tl = max((max_tl // _LANE) * _LANE, _LANE)
  per_c = n * tl * per_elem
  tc = min(max(int(budget // per_c), tc_min), cap)
  tc = bc if tc >= bc else _round_down8(tc)
  return False, tc, tl


# --------------------------------------------------------------------------- #
# Kernels
# --------------------------------------------------------------------------- #
def _bn_fused_kernel(x_ref, w_ref, b_ref, o_ref, mean_ref, var_ref,
                     *, inv_count, eps):
  """One-pass BN for a resident (N, TC, HW) slab: stats + normalize."""
  x = x_ref[...].astype(jnp.float32)                              # (N, TC, HW)
  s = jnp.sum(jnp.sum(x, axis=2, keepdims=True), axis=0)          # (TC, 1)
  sq = jnp.sum(jnp.sum(x * x, axis=2, keepdims=True), axis=0)     # (TC, 1)
  mu = s * inv_count
  var = jnp.maximum(sq * inv_count - mu * mu, 0.0)                # biased var
  inv_std = lax.rsqrt(var + eps)
  scale = w_ref[...] * inv_std                                    # (TC, 1)
  shift = b_ref[...] - mu * scale
  # Re-read x for the normalize so the f32 slab need not stay live across the
  # stats reduction (frees VMEM / vregs, especially for bf16 inputs).
  x2 = x_ref[...].astype(jnp.float32)
  o_ref[...] = (x2 * scale[None] + shift[None]).astype(o_ref.dtype)
  mean_ref[...] = mu
  var_ref[...] = var


def _bn_stats_kernel(x_ref, w_ref, b_ref, mean_ref, var_ref, scale_ref, shift_ref,
                     *, inv_count, eps, tl, hw, mask_lanes):
  """Pass 1: accumulate per-channel sum / sumsq over lane tiles; finalize once.

  mean_ref/var_ref hold running sum/sumsq during accumulation (resident output
  blocks across the `l` axis) and mean / biased-var after the last step.
  scale_ref/shift_ref (folded affine) are written only in the finalize step.
  """
  l = pl.program_id(1)
  nl = pl.num_programs(1)

  @pl.when(l == 0)
  def _init():
    mean_ref[...] = jnp.zeros_like(mean_ref)
    var_ref[...] = jnp.zeros_like(var_ref)

  def _accum(x):
    mean_ref[...] += jnp.sum(jnp.sum(x, axis=2, keepdims=True), axis=0)
    var_ref[...] += jnp.sum(jnp.sum(x * x, axis=2, keepdims=True), axis=0)

  if mask_lanes:
    # Lane mask only on the last (partial) tile; full tiles accumulate unmasked.
    @pl.when(l < nl - 1)
    def _full():
      _accum(x_ref[...].astype(jnp.float32))

    @pl.when(l == nl - 1)
    def _partial():
      lane = lax.broadcasted_iota(jnp.int32, (1, 1, tl), 2)
      x = jnp.where(l * tl + lane < hw, x_ref[...].astype(jnp.float32), 0.0)
      _accum(x)
  else:
    _accum(x_ref[...].astype(jnp.float32))

  @pl.when(l == nl - 1)
  def _finalize():
    mu = mean_ref[...] * inv_count
    var = jnp.maximum(var_ref[...] * inv_count - mu * mu, 0.0)
    mean_ref[...] = mu
    var_ref[...] = var
    inv_std = lax.rsqrt(var + eps)
    sc = w_ref[...] * inv_std
    scale_ref[...] = sc
    shift_ref[...] = b_ref[...] - mu * sc


def _bn_apply_kernel(x_ref, scale_ref, shift_ref, o_ref):
  """Pass 2: elementwise y = x * scale + shift (per-channel scalars)."""
  x = x_ref[...].astype(jnp.float32)                              # (N, TC, TL)
  o_ref[...] = (x * scale_ref[...][None] + shift_ref[...][None]).astype(o_ref.dtype)


# --------------------------------------------------------------------------- #
# Wrapper
# --------------------------------------------------------------------------- #
def fused_batch_norm2d(x, weight, bias, running_mean, running_var,
                       eps=1e-5, momentum=0.1, *,
                       force_two_pass=False,
                       lane_tile_cap=None,
                       channel_tile_cap=_CHANNEL_TILE_CAP,
                       vmem_budget=None,
                       vmem_limit=None):
  """Training-mode forward of HFTA _BatchNorm (BatchNorm2d flavour).

  x                 : [N, B, C, H, W] (any float dtype; kept native in HBM)
  weight, bias      : [B, C]
  running_mean/var  : [B, C]
  Returns (y, new_running_mean, new_running_var), y: [N, B, C, H, W] in x.dtype.
  """
  N, B, C, H, W = x.shape
  BC = B * C
  HW = H * W
  count = N * HW
  inv_count = 1.0 / float(count)

  auto_budget, auto_limit = _vmem_params()
  budget = auto_budget if vmem_budget is None else vmem_budget
  limit = auto_limit if vmem_limit is None else vmem_limit

  # Free reshape (no transpose / HBM copy): channels on sublanes, spatial on lanes.
  x3 = x.reshape(N, BC, HW)
  w2 = weight.reshape(BC, 1).astype(jnp.float32)
  b2 = bias.reshape(BC, 1).astype(jnp.float32)

  # Megacore cap: keep the "parallel" channel axis >= 2 programs when there are
  # enough channels (dual-TC v7x; a single extra grid step elsewhere).
  if BC >= 2 * _SUBLANE:
    half = (BC + 1) // 2
    mc_cap = ((half + _SUBLANE - 1) // _SUBLANE) * _SUBLANE
  else:
    mc_cap = BC

  use_fused, tc, tl = _pick_tiles(N, BC, HW, x.dtype.itemsize, budget,
                                  channel_tile_cap, mc_cap,
                                  force_two_pass, lane_tile_cap)
  nc = pl.cdiv(BC, tc)
  nl = pl.cdiv(HW, tl)

  if use_fused:
    # Whole reduction extent fits in one block: one-pass fused kernel
    # (x read once from HBM, y written once -> 2x traffic vs 3x for two-pass).
    y3, mean, var = pl.pallas_call(
        functools.partial(_bn_fused_kernel, inv_count=inv_count, eps=float(eps)),
        out_shape=(jax.ShapeDtypeStruct((N, BC, HW), x.dtype),
                   jax.ShapeDtypeStruct((BC, 1), jnp.float32),
                   jax.ShapeDtypeStruct((BC, 1), jnp.float32)),
        grid_spec=pltpu.PrefetchScalarGridSpec(
            num_scalar_prefetch=0,
            grid=(nc,),
            in_specs=[pl.BlockSpec((N, tc, HW), lambda i: (0, i, 0)),
                      pl.BlockSpec((tc, 1), lambda i: (i, 0)),
                      pl.BlockSpec((tc, 1), lambda i: (i, 0))],
            out_specs=[pl.BlockSpec((N, tc, HW), lambda i: (0, i, 0)),
                       pl.BlockSpec((tc, 1), lambda i: (i, 0)),
                       pl.BlockSpec((tc, 1), lambda i: (i, 0))]),
        compiler_params=pltpu.CompilerParams(
            dimension_semantics=("parallel",),
            vmem_limit_bytes=limit),
    )(x3, w2, b2)
  else:
    # Two-pass: (1) tiled reduction for per-channel stats + folded affine,
    #           (2) elementwise apply.
    mean, var, scale, shift = pl.pallas_call(
        functools.partial(_bn_stats_kernel, inv_count=inv_count, eps=float(eps),
                          tl=tl, hw=HW, mask_lanes=(HW % tl != 0)),
        out_shape=(jax.ShapeDtypeStruct((BC, 1), jnp.float32),) * 4,
        grid_spec=pltpu.PrefetchScalarGridSpec(
            num_scalar_prefetch=0,
            grid=(nc, nl),
            in_specs=[pl.BlockSpec((N, tc, tl), lambda i, l: (0, i, l)),
                      pl.BlockSpec((tc, 1), lambda i, l: (i, 0)),
                      pl.BlockSpec((tc, 1), lambda i, l: (i, 0))],
            out_specs=[pl.BlockSpec((tc, 1), lambda i, l: (i, 0))] * 4),
        compiler_params=pltpu.CompilerParams(
            dimension_semantics=("parallel", "arbitrary"),
            vmem_limit_bytes=limit),
    )(x3, w2, b2)

    y3 = pl.pallas_call(
        _bn_apply_kernel,
        out_shape=jax.ShapeDtypeStruct((N, BC, HW), x.dtype),
        grid_spec=pltpu.PrefetchScalarGridSpec(
            num_scalar_prefetch=0,
            grid=(nc, nl),
            in_specs=[pl.BlockSpec((N, tc, tl), lambda i, l: (0, i, l)),
                      pl.BlockSpec((tc, 1), lambda i, l: (i, 0)),
                      pl.BlockSpec((tc, 1), lambda i, l: (i, 0))],
            out_specs=pl.BlockSpec((N, tc, tl), lambda i, l: (0, i, l))),
        compiler_params=pltpu.CompilerParams(
            dimension_semantics=("parallel", "parallel"),
            vmem_limit_bytes=limit),
    )(x3, scale, shift)

  y = y3.reshape(N, B, C, H, W)

  # Running-stat update (PyTorch uses the unbiased variance for the buffer).
  bmean = mean.reshape(BC)
  bvar = var.reshape(BC)
  unbiased_var = bvar * (count / max(count - 1, 1))
  rm = running_mean.reshape(BC).astype(jnp.float32)
  rv = running_var.reshape(BC).astype(jnp.float32)
  new_rm = ((1.0 - momentum) * rm + momentum * bmean).reshape(B, C)
  new_rv = ((1.0 - momentum) * rv + momentum * unbiased_var).reshape(B, C)
  return y, new_rm, new_rv


# --------------------------------------------------------------------------- #
# Reference + test
# --------------------------------------------------------------------------- #
def _reference(x, weight, bias, eps):
  x = x.astype(jnp.float32)
  mean = jnp.mean(x, axis=(0, 3, 4), keepdims=True)
  var = jnp.mean(jnp.square(x - mean), axis=(0, 3, 4), keepdims=True)
  w = weight[None, :, :, None, None]
  b = bias[None, :, :, None, None]
  return (x - mean) / jnp.sqrt(var + eps) * w + b


if __name__ == "__main__":
  key = jax.random.PRNGKey(0)

  # ---- Case 1: small shapes, fused one-pass (resident slab) path -----------
  N, B, C, H, W = 2, 3, 4, 8, 8
  x = jax.random.normal(key, (N, B, C, H, W), dtype=jnp.float32)
  # reset_parameters(): weight=ones, bias=zeros, running_mean=zeros, running_var=ones
  weight = jnp.ones((B, C), jnp.float32)
  bias = jnp.zeros((B, C), jnp.float32)
  running_mean = jnp.zeros((B, C), jnp.float32)
  running_var = jnp.ones((B, C), jnp.float32)

  y, new_rm, new_rv = fused_batch_norm2d(
      x, weight, bias, running_mean, running_var, eps=1e-5, momentum=0.1)
  jax.block_until_ready((y, new_rm, new_rv))

  ref = _reference(x, weight, bias, 1e-5)
  assert y.shape == (N, B, C, H, W)
  assert jnp.allclose(y, ref, atol=1e-4, rtol=1e-4), "fused path: y mismatch"

  cnt = N * H * W
  bm_ref = jnp.mean(x, axis=(0, 3, 4))
  bv_ref = jnp.var(x, axis=(0, 3, 4)) * (cnt / (cnt - 1))
  assert jnp.allclose(new_rm, 0.9 * running_mean + 0.1 * bm_ref, atol=1e-4), \
      "running_mean mismatch"
  assert jnp.allclose(new_rv, 0.9 * running_var + 0.1 * bv_ref, atol=1e-4), \
      "running_var mismatch"

  # ---- Case 2: two-pass path with tiled reduction + masked partial tile ----
  N2, B2, C2, H2, W2 = 2, 3, 4, 20, 20   # HW=400 -> lane tiles of 128, last partial
  k1, k2, k3 = jax.random.split(jax.random.PRNGKey(1), 3)
  x2 = jax.random.normal(k1, (N2, B2, C2, H2, W2), dtype=jnp.float32)
  w2p = jax.random.normal(k2, (B2, C2), dtype=jnp.float32)
  b2p = jax.random.normal(k3, (B2, C2), dtype=jnp.float32)
  y2, rm2, rv2 = fused_batch_norm2d(
      x2, w2p, b2p, jnp.zeros((B2, C2), jnp.float32),
      jnp.ones((B2, C2), jnp.float32),
      eps=1e-5, momentum=0.1, force_two_pass=True, lane_tile_cap=128)
  jax.block_until_ready((y2, rm2, rv2))
  ref2 = _reference(x2, w2p, b2p, 1e-5)
  assert jnp.allclose(y2, ref2, atol=1e-4, rtol=1e-4), "two-pass path: y mismatch"

  # ---- Case 3: bf16 activations (native-dtype DMA, f32 compute in-kernel) --
  xb = x.astype(jnp.bfloat16)
  yb, _, _ = fused_batch_norm2d(
      xb, weight, bias, running_mean, running_var, eps=1e-5, momentum=0.1)
  jax.block_until_ready(yb)
  assert yb.dtype == jnp.bfloat16
  assert jnp.allclose(yb.astype(jnp.float32), ref, atol=1e-1, rtol=1e-1), \
      "bf16 path: y mismatch"

  print("KERNEL_OK")
</pallas_src>

<mosaic_0001>
module attributes {stable_mosaic.version = 11 : i64} {
  func.func @_bn_fused_kernel(%arg0: i32, %arg1: memref<2x12x64xf32, #tpu.memory_space<vmem>>, %arg2: memref<12x1xf32, #tpu.memory_space<vmem>>, %arg3: memref<12x1xf32, #tpu.memory_space<vmem>>, %arg4: memref<2x12x64xf32, #tpu.memory_space<vmem>>, %arg5: memref<12x1xf32, #tpu.memory_space<vmem>>, %arg6: memref<12x1xf32, #tpu.memory_space<vmem>>) attributes {dimension_semantics = [#tpu.dimension_semantics<parallel>], iteration_bounds = array<i64: 1>, scalar_prefetch = 0 : i64, scratch_operands = 0 : i64, tpu.core_type = #tpu.core_type<tc>, window_params = [{transform_indices = @transform_0, window_bounds = array<i64: 2, 12, 64>}, {transform_indices = @transform_1, window_bounds = array<i64: 12, 1>}, {transform_indices = @transform_2, window_bounds = array<i64: 12, 1>}, {transform_indices = @transform_3, window_bounds = array<i64: 2, 12, 64>}, {transform_indices = @transform_4, window_bounds = array<i64: 12, 1>}, {transform_indices = @transform_5, window_bounds = array<i64: 12, 1>}]} {
    %c0 = arith.constant 0 : index
    %c0_0 = arith.constant 0 : index
    %c0_1 = arith.constant 0 : index
    %0 = vector.load %arg1[%c0, %c0_0, %c0_1] : memref<2x12x64xf32, #tpu.memory_space<vmem>>, vector<2x12x64xf32>
    %cst = arith.constant dense<0.000000e+00> : vector<2x12xf32>
    %1 = vector.multi_reduction <add>, %0, %cst [2] : vector<2x12x64xf32> to vector<2x12xf32>
    %2 = vector.shape_cast %1 : vector<2x12xf32> to vector<2x12x1xf32>
    %cst_2 = arith.constant dense<0.000000e+00> : vector<12x1xf32>
    %3 = vector.multi_reduction <add>, %2, %cst_2 [0] : vector<2x12x1xf32> to vector<12x1xf32>
    %4 = arith.mulf %0, %0 : vector<2x12x64xf32>
    %cst_3 = arith.constant dense<0.000000e+00> : vector<2x12xf32>
    %5 = vector.multi_reduction <add>, %4, %cst_3 [2] : vector<2x12x64xf32> to vector<2x12xf32>
    %6 = vector.shape_cast %5 : vector<2x12xf32> to vector<2x12x1xf32>
    %cst_4 = arith.constant dense<0.000000e+00> : vector<12x1xf32>
    %7 = vector.multi_reduction <add>, %6, %cst_4 [0] : vector<2x12x1xf32> to vector<12x1xf32>
    %cst_5 = arith.constant 7.812500e-03 : f32
    %8 = vector.broadcast %cst_5 : f32 to vector<12x1xf32>
    %9 = arith.mulf %3, %8 : vector<12x1xf32>
    %cst_6 = arith.constant 7.812500e-03 : f32
    %10 = vector.broadcast %cst_6 : f32 to vector<12x1xf32>
    %11 = arith.mulf %7, %10 : vector<12x1xf32>
    %12 = arith.mulf %9, %9 : vector<12x1xf32>
    %13 = arith.subf %11, %12 : vector<12x1xf32>
    %cst_7 = arith.constant 0.000000e+00 : f32
    %14 = vector.broadcast %cst_7 : f32 to vector<12x1xf32>
    %15 = arith.maximumf %13, %14 : vector<12x1xf32>
    %cst_8 = arith.constant 9.99999974E-6 : f32
    %16 = vector.broadcast %cst_8 : f32 to vector<12x1xf32>
    %17 = arith.addf %15, %16 : vector<12x1xf32>
    %18 = math.rsqrt %17 : vector<12x1xf32>
    %c0_9 = arith.constant 0 : index
    %c0_10 = arith.constant 0 : index
    %19 = vector.load %arg2[%c0_9, %c0_10] : memref<12x1xf32, #tpu.memory_space<vmem>>, vector<12x1xf32>
    %20 = arith.mulf %19, %18 : vector<12x1xf32>
    %c0_11 = arith.constant 0 : index
    %c0_12 = arith.constant 0 : index
    %21 = vector.load %arg3[%c0_11, %c0_12] : memref<12x1xf32, #tpu.memory_space<vmem>>, vector<12x1xf32>
    %22 = arith.mulf %9, %20 : vector<12x1xf32>
    %23 = arith.subf %21, %22 : vector<12x1xf32>
    %c0_13 = arith.constant 0 : index
    %c0_14 = arith.constant 0 : index
    %c0_15 = arith.constant 0 : index
    %24 = vector.load %arg1[%c0_13, %c0_14, %c0_15] : memref<2x12x64xf32, #tpu.memory_space<vmem>>, vector<2x12x64xf32>
    %25 = vector.shape_cast %20 : vector<12x1xf32> to vector<1x12x1xf32>
    %26 = vector.broadcast %25 : vector<1x12x1xf32> to vector<2x12x64xf32>
    %27 = arith.mulf %24, %26 : vector<2x12x64xf32>
    %28 = vector.shape_cast %23 : vector<12x1xf32> to vector<1x12x1xf32>
    %29 = vector.broadcast %28 : vector<1x12x1xf32> to vector<2x12x64xf32>
    %30 = arith.addf %27, %29 : vector<2x12x64xf32>
    %c0_16 = arith.constant 0 : index
    %c0_17 = arith.constant 0 : index
    %c0_18 = arith.constant 0 : index
    %31 = vector.load %arg4[%c0_16, %c0_17, %c0_18] : memref<2x12x64xf32, #tpu.memory_space<vmem>>, vector<2x12x64xf32>
    tpu.vector_store %arg4[%c0_16, %c0_17, %c0_18], %30 {strides = array<i32>} : memref<2x12x64xf32, #tpu.memory_space<vmem>>, vector<2x12x64xf32>,
    %c0_19 = arith.constant 0 : index
    %c0_20 = arith.constant 0 : index
    %32 = vector.load %arg5[%c0_19, %c0_20] : memref<12x1xf32, #tpu.memory_space<vmem>>, vector<12x1xf32>
    tpu.vector_store %arg5[%c0_19, %c0_20], %9 {strides = array<i32>} : memref<12x1xf32, #tpu.memory_space<vmem>>, vector<12x1xf32>,
    %c0_21 = arith.constant 0 : index
    %c0_22 = arith.constant 0 : index
    %33 = vector.load %arg6[%c0_21, %c0_22] : memref<12x1xf32, #tpu.memory_space<vmem>>, vector<12x1xf32>
    tpu.vector_store %arg6[%c0_21, %c0_22], %15 {strides = array<i32>} : memref<12x1xf32, #tpu.memory_space<vmem>>, vector<12x1xf32>,
    return
  }
  func.func @transform_0(%arg0: i32) -> (i32, i32, i32) {
    %c0_i32 = arith.constant 0 : i32
    %c0_i32_0 = arith.constant 0 : i32
    %c0_i32_1 = arith.constant 0 : i32
    return %c0_i32, %arg0, %c0_i32_0 : i32, i32, i32
  }
  func.func @transform_1(%arg0: i32) -> (i32, i32) {
    %c0_i32 = arith.constant 0 : i32
    %c0_i32_0 = arith.constant 0 : i32
    return %arg0, %c0_i32 : i32, i32
  }
  func.func @transform_2(%arg0: i32) -> (i32, i32) {
    %c0_i32 = arith.constant 0 : i32
    %c0_i32_0 = arith.constant 0 : i32
    return %arg0, %c0_i32 : i32, i32
  }
  func.func @transform_3(%arg0: i32) -> (i32, i32, i32) {
    %c0_i32 = arith.constant 0 : i32
    %c0_i32_0 = arith.constant 0 : i32
    %c0_i32_1 = arith.constant 0 : i32
    return %c0_i32, %arg0, %c0_i32_0 : i32, i32, i32
  }
  func.func @transform_4(%arg0: i32) -> (i32, i32) {
    %c0_i32 = arith.constant 0 : i32
    %c0_i32_0 = arith.constant 0 : i32
    return %arg0, %c0_i32 : i32, i32
  }
  func.func @transform_5(%arg0: i32) -> (i32, i32) {
    %c0_i32 = arith.constant 0 : i32
    %c0_i32_0 = arith.constant 0 : i32
    return %arg0, %c0_i32 : i32, i32
  }
}

</mosaic_0001>

<bundles_post_ra>
// kernel: tpu_custom_call.1
= control target key start
LH: loop header
LB: loop body
LE: loop exit
PB: predicated region body
PF: predicated region fallthrough
CT: control target
= control target key end

     0   :  { %vm25_vm0 = vcmask 519168   ;;  %vm21_vm1 = vcmask 523264   ;;  %v160_v19 = vmov 0   ;;  %vm36_vm2 = vcmask 1043456   ;;  %s279_s0 = inlined_call_operand.vmem [shape: f32[2,12,64], index: 0, kind: input, shape index: {}]   ;;  %s280_s4 = inlined_call_operand.vmem [shape: f32[12,1], index: 4, kind: output, shape index: {1}]   ;;  %s281_s5 = inlined_call_operand.vmem [shape: f32[12,1], index: 5, kind: output, shape index: {2}]   ;;  %s282_s1 = inlined_call_operand.vmem [shape: f32[12,1], index: 1, kind: input, shape index: {}]   ;;  %s283_s2 = inlined_call_operand.vmem [shape: f32[12,1], index: 2, kind: input, shape index: {}]   ;;  %s284_s3 = inlined_call_operand.vmem [shape: f32[2,12,64], index: 3, kind: output, shape index: {0}]  }
   0x1   :  { %v194_v0 = vld [vmem:[%s279_s0 + $0x8] sm:$0xf]  ;;  %v199_v1 = vld [vmem:[%s279_s0] sm:$0xff]  ;;  %v210_v5 = vld [vmem:[%s279_s0 + $0x18] sm:$0xf]  ;;  %154 = vset.pattern.permute.xlu0 %v160_v19  ;;  %153 = vset.pattern.permute.xlu2 %v160_v19  ;;  %vm134_vm3 = vcmask 7168  }
   0x2   :  { %v26_v2 = vsel %vm25_vm0, %v194_v0, 0.0  ;;  %v22_v3 = vsel %vm21_vm1, %v199_v1, 0.0  ;;  %v41_v4 = vmul.f32 %v194_v0, %v194_v0  ;;  %v216_v7 = vld [vmem:[%s279_s0 + $0x10] sm:$0xff]  ;;  %v43_v8 = vmul.f32 %v210_v5, %v210_v5  ;;  %155 = vset.pattern.permute.xlu1 %v160_v19  ;;  %v93_v54 = vld [vmem:[%s282_s1 + $0x8] sm:$0xf]  ;;  %v92_v60 = vld [vmem:[%s282_s1] sm:$0xff] }
   0x3   :  { %27 = vadd.xlane.f32.xlu0 %v26_v2  ;;  %23 = vadd.xlane.f32.xlu1 %v22_v3  ;;  %v32_v9 = vsel %vm25_vm0, %v210_v5, 0.0  ;;  %v29_v10 = vsel %vm21_vm1, %v216_v7, 0.0  ;;  %v40_v12 = vmul.f32 %v199_v1, %v199_v1  ;;  %v42_v13 = vmul.f32 %v216_v7, %v216_v7  ;;  %v96_v63 = vld [vmem:[%s283_s2] sm:$0xff] }
   0x4   :  { %v47_v6 = vsel %vm25_vm0, %v41_v4, 0.0  ;;  %v53_v11 = vsel %vm25_vm0, %v43_v8, 0.0  ;;  %vm136_vm4 = vcmask 3072  }
   0x5   :  { %48 = vadd.xlane.f32.xlu2 %v47_v6  ;;  %v44_v14 = vsel %vm21_vm1, %v40_v12, 0.0  ;;  %v50_v15 = vsel %vm21_vm1, %v42_v13, 0.0  ;;  %v97_v6 = vld [vmem:[%s283_s2 + $0x8] sm:$0xf] }
   0xb   :  { %33 = vadd.xlane.f32.xlu0 %v32_v9  ;;  %30 = vadd.xlane.f32.xlu1 %v29_v10 }
   0xd   :  { %54 = vadd.xlane.f32.xlu2 %v53_v11 }
  0x13   :  { %45 = vadd.xlane.f32.xlu0 %v44_v14  ;;  %51 = vadd.xlane.f32.xlu1 %v50_v15 }
  0x76   :  { %v28_v16 = vpop.xlane.xlu0 %27  ;;  %v24_v17 = vpop.xlane.xlu1 %23 }
  0x77   :  { %v37_v22 = vsel %vm36_vm2, %v28_v16, 0.0 }
  0x78   :  { %v49_v18 = vpop.xlane.xlu2 %48 }
  0x79   :  { %v57_v23 = vsel %vm36_vm2, %v49_v18, 0.0 }
  0x7e   :  { %v34_v20 = vpop.xlane.xlu0 %33  ;;  %v31_v21 = vpop.xlane.xlu1 %30 }
  0x7f   :  { %v38_v24 = vsel %vm36_vm2, %v34_v20, 0.0  ;;  %v35_v25 = vadd.f32 %v31_v21, %v24_v17 }
  0x80   :  { %v39_v26 = vadd.f32 %v38_v24, %v37_v22  ;;  %v55_v27 = vpop.xlane.xlu2 %54 }
  0x81   :  { %v60_v28 = vmul.f32 0.0078125, %v35_v25  ;;  %v58_v29 = vsel %vm36_vm2, %v55_v27, 0.0 }
  0x82   :  { %v61_v30 = vmul.f32 0.0078125, %v39_v26  ;;  %v59_v31 = vadd.f32 %v58_v29, %v57_v23 }
  0x83   :  { %135 = vst.msk [vmem:[%s280_s4] sm:$0xff] %vm134_vm3, %v60_v28  ;;  %v64_v39 = vmul.f32 %v60_v28, %v60_v28 }
  0x84   :  { %137 = vst.msk [vmem:[%s280_s4 + $0x8] sm:$0xf] %vm136_vm4, %v61_v30  ;;  %v63_v32 = vmul.f32 0.0078125, %v59_v31  ;;  %v65_v33 = vmul.f32 %v61_v30, %v61_v30 }
  0x86   :  { %v67_v34 = vsub.f32 %v63_v32, %v65_v33  ;;  %v46_v35 = vpop.xlane.xlu0 %45  ;;  %v52_v36 = vpop.xlane.xlu1 %51 }
  0x87   :  { %v56_v37 = vadd.f32 %v52_v36, %v46_v35 }
  0x88   :  { %v69_v38 = vmax.f32 %v67_v34, 0.0 }
  0x89   :  { %v62_v40 = vmul.f32 0.0078125, %v56_v37 }
  0x8a   :  { %v71_v41 = vadd.f32 1e-05, %v69_v38  ;;  %139 = vst.msk [vmem:[%s281_s5 + $0x8] sm:$0xf] %vm136_vm4, %v69_v38 }
  0x8b   :  { %v66_v42 = vsub.f32 %v62_v40, %v64_v39 }
  0x8c   :  { %156 = vrsqrt.f32 %v71_v41  ;;  %vm88_vm6 = vweird.f32 %v71_v41 }
  0x8d   :  { %v68_v43 = vmax.f32 %v66_v42, 0.0 }
  0x8f   :  { %v70_v44 = vadd.f32 1e-05, %v68_v43  ;;  %138 = vst.msk [vmem:[%s281_s5] sm:$0xff] %vm134_vm3, %v68_v43 }
  0x91   :  { %158 = vrsqrt.f32 %v70_v44  ;;  %vm78_vm9 = vweird.f32 %v70_v44 }
  0x92   :  { %v157_v45 = vpop.eup %156 }
  0x93   :  { %v83_v46 = vmul.f32 %v157_v45, %v71_v41  ;;  %vm89_vm5 = vweird.f32 %v157_v45 }
  0x94   :  { %vm90_vm7 = vmor %vm88_vm6, %vm89_vm5 }
  0x95   :  { %v84_v47 = vmul.f32 %v157_v45, %v83_v46 }
  0x97   :  { %v159_v48 = vpop.eup %158  ;;  %v85_v49 = vmul.f32 0.5, %v84_v47 }
  0x98   :  { %v73_v50 = vmul.f32 %v159_v48, %v70_v44  ;;  %vm79_vm8 = vweird.f32 %v159_v48 }
  0x99   :  { %v86_v51 = vsub.f32 1.5, %v85_v49  ;;  %vm80_vm10 = vmor %vm78_vm9, %vm79_vm8 }
  0x9a   :  { %v74_v52 = vmul.f32 %v159_v48, %v73_v50 }
  0x9b   :  { %v87_v53 = vmul.f32 %v157_v45, %v86_v51 }
  0x9c   :  { %v75_v55 = vmul.f32 0.5, %v74_v52 }
  0x9d   :  { %v91_v56 = vsel %vm90_vm7, %v157_v45, %v87_v53 }
  0x9e   :  { %v95_v57 = vmul.f32 %v93_v54, %v91_v56  ;;  %v76_v58 = vsub.f32 1.5, %v75_v55 }
  0xa0   :  { %109 = vperm.xlu0 %154, %v95_v57   ;;  %v77_v59 = vmul.f32 %v159_v48, %v76_v58  ;;  %v99_v4 = vmul.f32 %v95_v57, %v61_v30 }
  0xa2   :  { %v81_v61 = vsel %vm80_vm10, %v159_v48, %v77_v59  ;;  %v101_v8 = vsub.f32 %v97_v6, %v99_v4 }
  0xa3   :  { %v94_v62 = vmul.f32 %v92_v60, %v81_v61 }
  0xa5   :  { %104 = vperm.xlu2 %153, %v94_v62   ;;  %v98_v2 = vmul.f32 %v94_v62, %v60_v28 }
  0xa7   :  { %v100_v3 = vsub.f32 %v96_v63, %v98_v2 }
  0xa9   :  { %118 = vperm.xlu1 %155, %v100_v3  }
  0xad   :  { %123 = vperm.xlu2 %153, %v101_v8  }
  0xff   :  { %v105_v9 = vpop.permute.xlu2 %104 }
 0x100   :  { %v112_v16 = vmul.f32 %v105_v9, %v199_v1  ;;  %v114_v17 = vmul.f32 %v105_v9, %v216_v7 }
 0x107   :  { %v124_v13 = vpop.permute.xlu2 %123 }
 0x112   :  { %v110_v10 = vpop.permute.xlu0 %109 }
 0x113   :  { %v113_v11 = vmul.f32 %v110_v10, %v194_v0  ;;  %v115_v12 = vmul.f32 %v110_v10, %v210_v5 }
 0x115   :  { %v127_v14 = vadd.f32 %v124_v13, %v113_v11  ;;  %v129_v15 = vadd.f32 %v124_v13, %v115_v12 }
 0x117   :  { %131 = vst.msk [vmem:[%s284_s3 + $0x8] sm:$0xf] %vm25_vm0, %v127_v14 }
 0x118   :  { %133 = vst.msk [vmem:[%s284_s3 + $0x18] sm:$0xf] %vm25_vm0, %v129_v15 }
 0x11b   :  { %v119_v0 = vpop.permute.xlu1 %118 }
 0x11c   :  { %v126_v18 = vadd.f32 %v119_v0, %v112_v16  ;;  %v128_v5 = vadd.f32 %v119_v0, %v114_v17 }
 0x11e   :  { %130 = vst.msk [vmem:[%s284_s3] sm:$0xff] %vm21_vm1, %v126_v18 }
 0x11f   :  { %132 = vst.msk [vmem:[%s284_s3 + $0x10] sm:$0xff] %vm21_vm1, %v128_v5 }

</bundles_post_ra>
